<compile_context>
chip_gen: v6e
topology: v6e:2x2x1
jax: 0.10.0
libtpu: 0.0.40
codegen_flags: <defaults>
</compile_context>

<pallas_src>
import jax
import jax.numpy as jnp
from jax.experimental import pallas as pl
from jax.experimental.pallas import tpu as pltpu


def _round_up(x, m):
    return ((x + m - 1) // m) * m


def _vmem_capacity_bytes():
    """Per-core VMEM capacity, conservatively assuming v7x (64 MiB) if unknown."""
    try:
        return int(pltpu.get_tpu_info().vmem_capacity_bytes)
    except Exception:  # info query only; pallas_call itself is never guarded
        return 64 << 20


def fgu_kernel(a_ref, t_ref, wa_ref, wt_ref, b_in_ref, wg_ref, bg_ref,
               o_ref, x_ref):
    j = pl.program_id(1)

    # Compute the full-width x = a@Wa + t@Wt + (ba+bt) once per batch tile.
    @pl.when(j == 0)
    def _():
        x = jnp.dot(a_ref[...], wa_ref[...], preferred_element_type=jnp.float32)
        x = x + jnp.dot(t_ref[...], wt_ref[...], preferred_element_type=jnp.float32)
        x_ref[...] = x + b_in_ref[...]

    x = x_ref[...]                                        # (tm, dout_pad) f32
    # Context-gating projection for this N tile: bf16 MXU dot, f32 accumulate.
    gate = jnp.dot(x.astype(wg_ref.dtype), wg_ref[...],
                   preferred_element_type=jnp.float32) + bg_ref[...]
    # GLU(cat(x, gate), dim=1) == x * sigmoid(gate), all in f32.
    tn = o_ref.shape[-1]
    start = pl.multiple_of(j * tn, tn)
    x_blk = x_ref[:, pl.ds(start, tn)]
    o_ref[...] = (x_blk * jax.nn.sigmoid(gate)).astype(o_ref.dtype)


def fused_gated_unit(audio, text, wa, ba, wt, bt, wg, bg, *,
                     tm=None, tn=None, out_dtype=None):
    """audio/text: (B, Din); wa/wt: (Din, Dout); wg: (Dout, Dout); biases: (1, Dout)."""
    B, din = audio.shape
    dout = wa.shape[1]
    out_dtype = audio.dtype if out_dtype is None else jnp.dtype(out_dtype)

    # Lane-dense output: pad Dout up to a multiple of 128.
    dout_pad = _round_up(max(dout, 128), 128)

    # ---- parameter prep (cheap one-time XLA ops outside the kernel) --------
    pad_n = dout_pad - dout
    wa_p = jnp.pad(wa, ((0, 0), (0, pad_n))).astype(jnp.bfloat16)   # (Din, Dout_pad)
    wt_p = jnp.pad(wt, ((0, 0), (0, pad_n))).astype(jnp.bfloat16)   # (Din, Dout_pad)
    b_in = jnp.pad(ba + bt, ((0, 0), (0, pad_n))).astype(jnp.float32)
    wg_p = jnp.pad(wg, ((0, pad_n), (0, pad_n))).astype(jnp.bfloat16)
    bg_p = jnp.pad(bg, ((0, 0), (0, pad_n))).astype(jnp.float32)
    a_bf16 = audio.astype(jnp.bfloat16)
    t_bf16 = text.astype(jnp.bfloat16)

    # ---- tiling -------------------------------------------------------------
    vmem_cap = _vmem_capacity_bytes()
    if tm is None:
        tm = 512 if vmem_cap >= (96 << 20) else 256      # bigger tiles on v5e/v6e
    tm = max(8, min(tm, _round_up(B, 8)))                 # never pad tiny batches up

    if tn is None:
        if dout_pad <= 2048:
            tn = dout_pad                                  # wg fully resident (<= 8 MiB)
        else:
            tn = 128                                       # largest pow2*128 divisor, <= 1024
            while tn < 1024 and dout_pad % (tn * 2) == 0:
                tn *= 2
    assert dout_pad % tn == 0
    grid = (pl.cdiv(B, tm), dout_pad // tn)

    # ---- VMEM budget: matches the actual (double-buffered) pipeline --------
    bpe_out = jnp.dtype(out_dtype).itemsize
    vmem_bytes = (
        2 * 2 * tm * din * 2                  # audio+text bf16 tiles, double-buffered
        + 2 * 2 * din * dout_pad * 2          # Wa+Wt bf16, double-buffered
        + 2 * dout_pad * 4                    # fused input bias (f32), double-buffered
        + 2 * dout_pad * tn * 2               # wg tile bf16, double-buffered
        + 2 * tn * 4                          # bg tile f32, double-buffered
        + 2 * tm * tn * bpe_out               # output tile, double-buffered
        + tm * dout_pad * 4                   # x scratch (f32, single buffer)
        + tm * dout_pad * 2 + 3 * tm * tn * 4 # bf16 x cast + f32 intermediates
    )
    vmem_limit = int(min(max(int(vmem_bytes * 1.5), 16 << 20), (vmem_cap * 3) // 4))

    out = pl.pallas_call(
        fgu_kernel,
        out_shape=jax.ShapeDtypeStruct((B, dout_pad), out_dtype),
        grid=grid,
        in_specs=[
            pl.BlockSpec((tm, din), lambda i, j: (i, 0)),          # audio tile
            pl.BlockSpec((tm, din), lambda i, j: (i, 0)),          # text tile
            pl.BlockSpec((din, dout_pad), lambda i, j: (0, 0)),    # Wa (resident)
            pl.BlockSpec((din, dout_pad), lambda i, j: (0, 0)),    # Wt (resident)
            pl.BlockSpec((1, dout_pad), lambda i, j: (0, 0)),      # ba+bt (resident)
            pl.BlockSpec((dout_pad, tn), lambda i, j: (0, j)),     # Wg N-tile
            pl.BlockSpec((1, tn), lambda i, j: (0, j)),            # bg N-tile
        ],
        out_specs=pl.BlockSpec((tm, tn), lambda i, j: (i, j)),
        scratch_shapes=[pltpu.VMEM((tm, dout_pad), jnp.float32)],  # x, reused across N tiles
        compiler_params=pltpu.CompilerParams(
            dimension_semantics=("parallel", "arbitrary"),  # megacore split of batch axis
            vmem_limit_bytes=vmem_limit,
        ),
    )(a_bf16, t_bf16, wa_p, wt_p, b_in, wg_p, bg_p)

    return out[:, :dout] if dout_pad != dout else out


def reference(audio, text, wa, ba, wt, bt, wg, bg):
    x = audio @ wa + ba + text @ wt + bt
    gate = x @ wg + bg
    return x * jax.nn.sigmoid(gate)


if __name__ == "__main__":
    # Small shapes consistent with the module: batch=8, input_dim=32, output_dim=32
    B, Din, Dout = 8, 32, 32
    key = jax.random.PRNGKey(0)
    ks = jax.random.split(key, 8)

    audio = jax.random.normal(ks[0], (B, Din), dtype=jnp.float32)
    text = jax.random.normal(ks[1], (B, Din), dtype=jnp.float32)

    # Deterministic parameter init (uniform, PyTorch-Linear-style bound), stored as (in, out)
    def init_linear(kw, kb, fan_in, fan_out):
        bound = 1.0 / (fan_in ** 0.5)
        w = jax.random.uniform(kw, (fan_in, fan_out), jnp.float32, -bound, bound)
        b = jax.random.uniform(kb, (1, fan_out), jnp.float32, -bound, bound)
        return w, b

    wa, ba = init_linear(ks[2], ks[3], Din, Dout)   # fc_audio
    wt, bt = init_linear(ks[4], ks[5], Din, Dout)   # fc_text
    wg, bg = init_linear(ks[6], ks[7], Dout, Dout)  # cg.fc

    out = fused_gated_unit(audio, text, wa, ba, wt, bt, wg, bg)
    out = jax.block_until_ready(out)

    ref = reference(audio, text, wa, ba, wt, bt, wg, bg)
    assert out.shape == (B, Dout)
    assert bool(jnp.isfinite(out).all())
    # bf16 MXU dots with f32 accumulation -> compare with bf16-level tolerance.
    # TODO(synk): use an f32 (3-pass) gate matmul if tighter-than-bf16 accuracy is required.
    assert jnp.allclose(out, ref, atol=2e-2, rtol=2e-2), "mismatch vs reference"

    print("KERNEL_OK")
</pallas_src>

<mosaic_0001>
module attributes {stable_mosaic.version = 11 : i64} {
  func.func @fgu_kernel(%arg0: i32, %arg1: i32, %arg2: memref<8x32xbf16, #tpu.memory_space<vmem>>, %arg3: memref<8x32xbf16, #tpu.memory_space<vmem>>, %arg4: memref<32x128xbf16, #tpu.memory_space<vmem>>, %arg5: memref<32x128xbf16, #tpu.memory_space<vmem>>, %arg6: memref<1x128xf32, #tpu.memory_space<vmem>>, %arg7: memref<128x128xbf16, #tpu.memory_space<vmem>>, %arg8: memref<1x128xf32, #tpu.memory_space<vmem>>, %arg9: memref<8x128xf32, #tpu.memory_space<vmem>>, %arg10: memref<8x128xf32, #tpu.memory_space<vmem>>) attributes {dimension_semantics = [#tpu.dimension_semantics<parallel>, #tpu.dimension_semantics<arbitrary>], iteration_bounds = array<i64: 1, 1>, scalar_prefetch = 0 : i64, scratch_operands = 1 : i64, tpu.core_type = #tpu.core_type<tc>, window_params = [{transform_indices = @transform_0, window_bounds = array<i64: 8, 32>}, {transform_indices = @transform_1, window_bounds = array<i64: 8, 32>}, {pipeline_mode = #tpu.pipeline_mode<synchronous>, transform_indices = @transform_2, window_bounds = array<i64: 32, 128>}, {pipeline_mode = #tpu.pipeline_mode<synchronous>, transform_indices = @transform_3, window_bounds = array<i64: 32, 128>}, {pipeline_mode = #tpu.pipeline_mode<synchronous>, transform_indices = @transform_4, window_bounds = array<i64: 1, 128>}, {transform_indices = @transform_5, window_bounds = array<i64: 128, 128>}, {transform_indices = @transform_6, window_bounds = array<i64: 1, 128>}, {transform_indices = @transform_7, window_bounds = array<i64: 8, 128>}]} {
    %c0_i32 = arith.constant 0 : i32
    %0 = arith.cmpi eq, %arg1, %c0_i32 : i32
    %1 = arith.extui %0 : i1 to i32
    %c0_i32_0 = arith.constant 0 : i32
    %2 = arith.cmpi ne, %1, %c0_i32_0 : i32
    scf.if %2 {
      %c0_10 = arith.constant 0 : index
      %c0_11 = arith.constant 0 : index
      %21 = vector.load %arg2[%c0_10, %c0_11] : memref<8x32xbf16, #tpu.memory_space<vmem>>, vector<8x32xbf16>
      %c0_12 = arith.constant 0 : index
      %c0_13 = arith.constant 0 : index
      %22 = vector.load %arg4[%c0_12, %c0_13] : memref<32x128xbf16, #tpu.memory_space<vmem>>, vector<32x128xbf16>
      %cst_14 = arith.constant dense<0.000000e+00> : vector<8x128xf32>
      %23 = tpu.matmul %21, %22, %cst_14 {dimension_numbers = #tpu.dot_dimension_numbers<[1], [0], [0], [1], [0, 0, 1, 1], [], []>} : vector<8x32xbf16>, vector<32x128xbf16>, vector<8x128xf32> -> vector<8x128xf32>
      %c0_15 = arith.constant 0 : index
      %c0_16 = arith.constant 0 : index
      %24 = vector.load %arg3[%c0_15, %c0_16] : memref<8x32xbf16, #tpu.memory_space<vmem>>, vector<8x32xbf16>
      %c0_17 = arith.constant 0 : index
      %c0_18 = arith.constant 0 : index
      %25 = vector.load %arg5[%c0_17, %c0_18] : memref<32x128xbf16, #tpu.memory_space<vmem>>, vector<32x128xbf16>
      %cst_19 = arith.constant dense<0.000000e+00> : vector<8x128xf32>
      %26 = tpu.matmul %24, %25, %cst_19 {dimension_numbers = #tpu.dot_dimension_numbers<[1], [0], [0], [1], [0, 0, 1, 1], [], []>} : vector<8x32xbf16>, vector<32x128xbf16>, vector<8x128xf32> -> vector<8x128xf32>
      %27 = arith.addf %23, %26 : vector<8x128xf32>
      %c0_20 = arith.constant 0 : index
      %c0_21 = arith.constant 0 : index
      %28 = vector.load %arg6[%c0_20, %c0_21] : memref<1x128xf32, #tpu.memory_space<vmem>>, vector<1x128xf32>
      %29 = vector.broadcast %28 : vector<1x128xf32> to vector<8x128xf32>
      %30 = arith.addf %27, %29 : vector<8x128xf32>
      %c0_22 = arith.constant 0 : index
      %c0_23 = arith.constant 0 : index
      %31 = vector.load %arg10[%c0_22, %c0_23] : memref<8x128xf32, #tpu.memory_space<vmem>>, vector<8x128xf32>
      tpu.vector_store %arg10[%c0_22, %c0_23], %30 {strides = array<i32>} : memref<8x128xf32, #tpu.memory_space<vmem>>, vector<8x128xf32>,
    } else {
    }
    %c0 = arith.constant 0 : index
    %c0_1 = arith.constant 0 : index
    %3 = vector.load %arg10[%c0, %c0_1] : memref<8x128xf32, #tpu.memory_space<vmem>>, vector<8x128xf32>
    %4 = arith.truncf %3 : vector<8x128xf32> to vector<8x128xbf16>
    %c0_2 = arith.constant 0 : index
    %c0_3 = arith.constant 0 : index
    %5 = vector.load %arg7[%c0_2, %c0_3] : memref<128x128xbf16, #tpu.memory_space<vmem>>, vector<128x128xbf16>
    %cst = arith.constant dense<0.000000e+00> : vector<8x128xf32>
    %6 = tpu.matmul %4, %5, %cst {dimension_numbers = #tpu.dot_dimension_numbers<[1], [0], [0], [1], [0, 0, 1, 1], [], []>} : vector<8x128xbf16>, vector<128x128xbf16>, vector<8x128xf32> -> vector<8x128xf32>
    %c0_4 = arith.constant 0 : index
    %c0_5 = arith.constant 0 : index
    %7 = vector.load %arg8[%c0_4, %c0_5] : memref<1x128xf32, #tpu.memory_space<vmem>>, vector<1x128xf32>
    %8 = vector.broadcast %7 : vector<1x128xf32> to vector<8x128xf32>
    %9 = arith.addf %6, %8 : vector<8x128xf32>
    %c128_i32 = arith.constant 128 : i32
    %10 = arith.muli %arg1, %c128_i32 : i32
    %11 = tpu.assume_multiple %10, 128 : i32
    %c0_6 = arith.constant 0 : index
    %12 = arith.index_cast %11 : i32 to index
    %13 = vector.load %arg10[%c0_6, %12] : memref<8x128xf32, #tpu.memory_space<vmem>>, vector<8x128xf32>
    %14 = arith.negf %9 : vector<8x128xf32>
    %15 = math.exp %14 : vector<8x128xf32>
    %cst_7 = arith.constant 1.000000e+00 : f32
    %16 = vector.broadcast %cst_7 : f32 to vector<8x128xf32>
    %17 = arith.addf %16, %15 : vector<8x128xf32>
    %18 = arith.divf %16, %17 : vector<8x128xf32>
    %19 = arith.mulf %13, %18 : vector<8x128xf32>
    %c0_8 = arith.constant 0 : index
    %c0_9 = arith.constant 0 : index
    %20 = vector.load %arg9[%c0_8, %c0_9] : memref<8x128xf32, #tpu.memory_space<vmem>>, vector<8x128xf32>
    tpu.vector_store %arg9[%c0_8, %c0_9], %19 {strides = array<i32>} : memref<8x128xf32, #tpu.memory_space<vmem>>, vector<8x128xf32>,
    return
  }
  func.func @transform_0(%arg0: i32, %arg1: i32) -> (i32, i32) {
    %c0_i32 = arith.constant 0 : i32
    %c0_i32_0 = arith.constant 0 : i32
    return %arg0, %c0_i32 : i32, i32
  }
  func.func @transform_1(%arg0: i32, %arg1: i32) -> (i32, i32) {
    %c0_i32 = arith.constant 0 : i32
    %c0_i32_0 = arith.constant 0 : i32
    return %arg0, %c0_i32 : i32, i32
  }
  func.func @transform_2(%arg0: i32, %arg1: i32) -> (i32, i32) {
    %c0_i32 = arith.constant 0 : i32
    %c0_i32_0 = arith.constant 0 : i32
    %c0_i32_1 = arith.constant 0 : i32
    return %c0_i32, %c0_i32_0 : i32, i32
  }
  func.func @transform_3(%arg0: i32, %arg1: i32) -> (i32, i32) {
    %c0_i32 = arith.constant 0 : i32
    %c0_i32_0 = arith.constant 0 : i32
    %c0_i32_1 = arith.constant 0 : i32
    return %c0_i32, %c0_i32_0 : i32, i32
  }
  func.func @transform_4(%arg0: i32, %arg1: i32) -> (i32, i32) {
    %c0_i32 = arith.constant 0 : i32
    %c0_i32_0 = arith.constant 0 : i32
    %c0_i32_1 = arith.constant 0 : i32
    return %c0_i32, %c0_i32_0 : i32, i32
  }
  func.func @transform_5(%arg0: i32, %arg1: i32) -> (i32, i32) {
    %c0_i32 = arith.constant 0 : i32
    %c0_i32_0 = arith.constant 0 : i32
    return %c0_i32, %arg1 : i32, i32
  }
  func.func @transform_6(%arg0: i32, %arg1: i32) -> (i32, i32) {
    %c0_i32 = arith.constant 0 : i32
    %c0_i32_0 = arith.constant 0 : i32
    return %c0_i32, %arg1 : i32, i32
  }
  func.func @transform_7(%arg0: i32, %arg1: i32) -> (i32, i32) {
    %c0_i32 = arith.constant 0 : i32
    return %arg0, %arg1 : i32, i32
  }
}

</mosaic_0001>

<bundles_post_ra>
// kernel: tpu_custom_call.1
= control target key start
LH: loop header
LB: loop body
LE: loop exit
PB: predicated region body
PF: predicated region fallthrough
CT: control target
= control target key end

     0   :  { %12 = vsyncpa [#allocation4], 0  ;;  %s680_s0 = inlined_call_operand.hbm [shape: bf16[8,32], index: 0, kind: input, shape index: {}]   ;;  %s681_s1 = inlined_call_operand.hbm [shape: bf16[8,32], index: 1, kind: input, shape index: {}]   ;;  %s682_s2 = inlined_call_operand.hbm [shape: bf16[32,128], index: 2, kind: input, shape index: {}]   ;;  %s683_s3 = inlined_call_operand.hbm [shape: bf16[32,128], index: 3, kind: input, shape index: {}]   ;;  %s684_s4 = inlined_call_operand.vmem [shape: f32[1,128], index: 4, kind: input, shape index: {}]   ;;  %s685_s5 = inlined_call_operand.hbm [shape: bf16[128,128], index: 5, kind: input, shape index: {}]   ;;  %s686_s6 = inlined_call_operand.vmem [shape: f32[1,128], index: 6, kind: input, shape index: {}]   ;;  %s687_s7 = inlined_call_operand.hbm [shape: f32[8,128], index: 7, kind: output, shape index: {}]  }
   0x1   :  { %13 = vsyncpa [#allocation7], 0 }
   0x2   :  { %14 = vsyncpa [#allocation10], 0 }
   0x3   :  { %15 = vsyncpa [#allocation5], 0  ;;  %s592_s24 = smov [#allocation6]  }
   0x4   :  { %s32_s25 = sshll.u32 %s592_s24, 4  ;;  %s33_s25 = int_to_ptr.vmem [resolvable:$true] %s32_s25 }
   0x5   :  { %s472_s26 = scalar_lea.vmem %s33_s25, 64  ;;  %p477_p1 = scmp.lt.s32.totalorder %s33_s25, %s33_s25 }
   0x6   :  { %p473_p0 = scmp.ne.s32.totalorder %s33_s25, %s472_s26  ;;  %p478_p2 = scmp.lt.s32.totalorder %s472_s26, %s472_s26 }
   0x8   :  { %p479_p3 = por %p478_p2, %p477_p1 }
   0xa   :  { %p480_p4 = pnand %p479_p3, %p473_p0 }
   0xc   :  { %483 = shalt.err (!%p480_p4)
}
   0xd   :  { %35 = dma.hbm_to_vmem [thread:$0]  %s681_s1, 64, %s33_s25, [#allocation7]  }
   0xe   :  { %s593_s29 = smov [#allocation9]   ;;  %s594_s8 = smov [#allocation3]  }
   0xf   :  { %s53_s30 = sshll.u32 %s593_s29, 4  ;;  %s22_s9 = sshll.u32 %s594_s8, 4  ;;  %s54_s30 = int_to_ptr.vmem [resolvable:$true] %s53_s30  ;;  %s23_s9 = int_to_ptr.vmem [resolvable:$true] %s22_s9 }
  0x10   :  { %s492_s10 = scalar_lea.vmem %s54_s30, 256  ;;  %p497_p6 = scmp.lt.s32.totalorder %s54_s30, %s54_s30 }
  0x11   :  { %p493_p5 = scmp.ne.s32.totalorder %s54_s30, %s492_s10  ;;  %p498_p7 = scmp.lt.s32.totalorder %s492_s10, %s492_s10 }
  0x13   :  { %p499_p8 = por %p498_p7, %p497_p6 }
  0x15   :  { %p500_p9 = pnand %p499_p8, %p493_p5 }
  0x17   :  { %503 = shalt.err (!%p500_p9)
}
  0x18   :  { %s595_s11 = smov 64   ;;  %s596_s12 = smov 4  }
  0x19   :  { %59 = dma.hbm_to_vmem [thread:$0]  %s683_s3, 256, %s54_s30, [#allocation10], %s595_s11, %s595_s11, %s596_s12  }
  0x1a   :  { %s512_s1 = scalar_lea.vmem %s23_s9, 64  ;;  %p517_p11 = scmp.lt.s32.totalorder %s23_s9, %s23_s9 }
  0x1b   :  { %p513_p10 = scmp.ne.s32.totalorder %s23_s9, %s512_s1  ;;  %p518_p12 = scmp.lt.s32.totalorder %s512_s1, %s512_s1 }
  0x1d   :  { %p519_p13 = por %p518_p12, %p517_p11 }
  0x1f   :  { %p520_p0 = pnand %p519_p13, %p513_p10 }
  0x21   :  { %523 = shalt.err (!%p520_p0)
}
  0x22   :  { %25 = dma.hbm_to_vmem [thread:$0]  %s680_s0, 64, %s23_s9, [#allocation4]  }
  0x23   :  { %s597_s17 = smov [#allocation8]   ;;  %s598_s19 = smov [#allocation11]  }
  0x24   :  { %s41_s18 = sshll.u32 %s597_s17, 4  ;;  %s67_s20 = sshll.u32 %s598_s19, 4  ;;  %s42_s18 = int_to_ptr.vmem [resolvable:$true] %s41_s18  ;;  %s68_s20 = int_to_ptr.vmem [resolvable:$true] %s67_s20 }
  0x25   :  { %s532_s21 = scalar_lea.vmem %s42_s18, 256  ;;  %p537_p2 = scmp.lt.s32.totalorder %s42_s18, %s42_s18 }
  0x26   :  { %p533_p1 = scmp.ne.s32.totalorder %s42_s18, %s532_s21  ;;  %p538_p3 = scmp.lt.s32.totalorder %s532_s21, %s532_s21 }
  0x28   :  { %p539_p4 = por %p538_p3, %p537_p2 }
  0x2a   :  { %p540_p5 = pnand %p539_p4, %p533_p1 }
  0x2c   :  { %543 = shalt.err (!%p540_p5)
}
  0x2d   :  { %47 = dma.hbm_to_vmem [thread:$0]  %s682_s2, 256, %s42_s18, [#allocation7], %s595_s11, %s595_s11, %s596_s12  }
  0x2e   :  { %s552_s0 = scalar_lea.vmem %s68_s20, 1024  ;;  %p557_p7 = scmp.lt.s32.totalorder %s68_s20, %s68_s20 }
  0x2f   :  { %p553_p6 = scmp.ne.s32.totalorder %s68_s20, %s552_s0  ;;  %p558_p8 = scmp.lt.s32.totalorder %s552_s0, %s552_s0 }
  0x31   :  { %p559_p9 = por %p558_p8, %p557_p7 }
  0x33   :  { %p560_p10 = pnand %p559_p9, %p553_p6 }
  0x35   :  { %563 = shalt.err (!%p560_p10)
}
  0x36   :  { %73 = dma.hbm_to_vmem [thread:$0]  %s685_s5, 1024, %s68_s20, [#allocation10], %s595_s11, %s595_s11, %s596_s12  }
  0x37   :  { %584 = dma.done.wait [#allocation4], 64  }
  0x38   :  { %585 = vsyncadd [#allocation4], 4294967232 }
  0x39   :  { %586 = dma.done.wait [#allocation7], 320  }
  0x3a   :  { %587 = vsyncadd [#allocation7], 4294966976 }
  0x3b   :  { %588 = dma.done.wait [#allocation10], 1280  }
  0x3c   :  { %589 = vsyncadd [#allocation10], 4294966016  ;;  %v599_v0 = vmov 0.0   ;;  %vm600_vm0 = vmmov 0   ;;  %v448_v1 = vld [vmem:[#allocation9 + $0x8] sm:$0xff]   ;;  %v449_v2 = vld [vmem:[#allocation9] sm:$0xff]  }
  0x3d   :  { %402 = vmatprep.subr.bf16.mxu1 %v599_v0  ;;  %406 = vmatprep.mubr.msk.bf16.mxu1 %vm600_vm0, %v599_v0  ;;  %v101_v3 = vld [vmem:[#allocation6] sm:$0xf]  ;;  %vm118_vm1 = vcmask 261120   ;;  %v450_v5 = vld [vmem:[#allocation8 + $0x8] sm:$0xff]   ;;  %v453_v6 = vld [vmem:[#allocation11 + $0x30] sm:$0xff]  }
  0x3e   :  { %418 = vmatprep.subr.bf16.mxu0 %v599_v0  ;;  %434 = vmatprep.mubr.msk.bf16.mxu0 %vm600_vm0, %v599_v0  ;;  %v452_v4 = vld [vmem:[#allocation11 + $0x38] sm:$0xff]   ;;  %v451_v7 = vld [vmem:[#allocation8] sm:$0xff]   ;;  %v454_v8 = vld [vmem:[#allocation11 + $0x28] sm:$0xff]  }
  0x3f   :  { %403 = vmatpush3.bf16.msra.mxu1 %v448_v1  ;;  %419 = vmatpush3.bf16.msra.mxu0 %v452_v4  ;;  %v96_v9 = vld [vmem:[#allocation3] sm:$0xf]  ;;  %v455_v10 = vld [vmem:[#allocation11 + $0x20] sm:$0xff]   ;;  %v457_v12 = vld [vmem:[#allocation11 + $0x10] sm:$0xff]  }
  0x40   :  { %404 = vmatprep.subr.bf16.mxu1 %v599_v0  ;;  %420 = vmatprep.subr.bf16.mxu0 %v599_v0  ;;  %v456_v11 = vld [vmem:[#allocation11 + $0x18] sm:$0xff]   ;;  %v458_v13 = vld [vmem:[#allocation11 + $0x8] sm:$0xff]   ;;  %v459_v14 = vld [vmem:[#allocation11] sm:$0xff]  }
  0x41   :  { %v376_v20 = vld [vmem:[%s684_s4] ss:$0 sm:$0xff]  ;;  %s601_s4 = smov [#allocation12]  }
  0x42   :  { %v377_v27 = vld [vmem:[%s686_s6] ss:$0 sm:$0xff]  ;;  %s358_s27 = sshll.u32 %s601_s4, 4  ;;  %s359_s27 = int_to_ptr.vmem [resolvable:$true] %s358_s27 }
  0x43   :  { %405 = vmatpush3.bf16.msra.mxu1 %v449_v2  ;;  %421 = vmatpush3.bf16.msra.mxu0 %v453_v6  ;;  %s564_s28 = scalar_lea.vmem %s359_s27, 128  ;;  %p569_p12 = scmp.lt.s32.totalorder %s359_s27, %s359_s27 }
  0x44   :  { %410 = vmatprep.subr.bf16.mxu1 %v599_v0  ;;  %422 = vmatprep.subr.bf16.mxu0 %v599_v0  ;;  %p565_p11 = scmp.ne.s32.totalorder %s359_s27, %s564_s28  ;;  %p570_p13 = scmp.lt.s32.totalorder %s564_s28, %s564_s28 }
  0x46   :  { %407 = vmatmul.mubr.msk.bf16.vlgmr.msra.gmra.mxu1 %vm118_vm1, %v101_v3  ;;  %p571_p0 = por %p570_p13, %p569_p12 }
  0x47   :  { %411 = vmatpush3.bf16.msra.mxu1 %v450_v5  ;;  %414 = vmatprep.mubr.msk.bf16.mxu1 %vm600_vm0, %v599_v0 }
  0x48   :  { %412 = vmatprep.subr.bf16.mxu1 %v599_v0  ;;  %423 = vmatpush3.bf16.msra.mxu0 %v454_v8  ;;  %p572_p1 = pnand %p571_p0, %p565_p11 }
  0x49   :  { %424 = vmatprep.subr.bf16.mxu0 %v599_v0 }
  0x4b   :  { %413 = vmatpush3.bf16.msra.mxu1 %v451_v7 }
  0x4c   :  { %425 = vmatpush3.bf16.msra.mxu0 %v455_v10 }
  0x4d   :  { %426 = vmatprep.subr.bf16.mxu0 %v599_v0 }
  0x4e   :  { %415 = vmatmul.mubr.msk.bf16.vlgmr.msra.gmra.mxu1 %vm118_vm1, %v96_v9 }
  0x50   :  { %427 = vmatpush3.bf16.msra.mxu0 %v456_v11 }
  0x51   :  { %428 = vmatprep.subr.bf16.mxu0 %v599_v0 }
  0x54   :  { %429 = vmatpush3.bf16.msra.mxu0 %v457_v12 }
  0x55   :  { %430 = vmatprep.subr.bf16.mxu0 %v599_v0 }
  0x58   :  { %431 = vmatpush3.bf16.msra.mxu0 %v458_v13 }
  0x59   :  { %432 = vmatprep.subr.bf16.mxu0 %v599_v0 }
  0x5c   :  { %433 = vmatpush3.bf16.msra.mxu0 %v459_v14 }
 0x106   :  { %v156_v15 = vpop.f32.mrf.mxu1 }
 0x108   :  { %v408_v16 = vpop.f32.mrf.mxu1 }
 0x10a   :  { %v159_v17 = vpop.f32.mrf.mxu1 }
 0x10c   :  { %v409_v18 = vpop.f32.mrf.mxu1 }
 0x10e   :  { %v211_v19 = vpop.f32.mrf.mxu1 }
 0x10f   :  { %v212_v21 = vadd.f32 %v211_v19, %v156_v15 }
 0x110   :  { %v416_v22 = vpop.f32.mrf.mxu1 }
 0x111   :  { %v224_v23 = vadd.f32 %v376_v20, %v212_v21 }
 0x112   :  { %v214_v24 = vpop.f32.mrf.mxu1 }
 0x113   :  { %v227_v25 = vpack.c.bf16 %v224_v23, %v224_v23 }
 0x114   :  { %v417_v26 = vpop.f32.mrf.mxu1 }
 0x115   :  { %435 = vmatmul.mubr.bf16.vlgmr.msra.gmra.mxu0 %v227_v25 }
 0x1d5   :  { %v333_v28 = vpop.f32.mrf.mxu0 }
 0x1d6   :  { %v334_v29 = vadd.f32 %v377_v27, %v333_v28 }
 0x1d7   :  { %v436_v30 = vpop.f32.mrf.mxu0 }
 0x1d8   :  { %v386_v31 = vmul.f32 -1.442695, %v334_v29 }
 0x1d9   :  { %v336_v32 = vpop.f32.mrf.mxu0 }
 0x1da   :  { %460 = vpow2.f32 %v386_v31 }
 0x1db   :  { %v437_v33 = vpop.f32.mrf.mxu0 }
 0x1e7   :  { %v461_v34 = vpop.eup %460 }
 0x1e8   :  { %v347_v35 = vadd.f32 1.0, %v461_v34 }
 0x1ea   :  { %462 = vrcp.f32 %v347_v35 }
 0x1f7   :  { %v463_v36 = vpop.eup %462 }
 0x1f8   :  { %v350_v37 = vmul.f32 %v463_v36, %v224_v23 }
 0x1fa   :  { %351 = vst [vmem:[#allocation12] sm:$0xff] %v350_v37 }
 0x1fb   :  { %575 = shalt.err (!%p572_p1)
}
 0x1fc   :  { %361 = dma.vmem_to_hbm [thread:$0]  %s359_s27, 128, %s687_s7, [#allocation5]  }
 0x1fd   :  { %590 = dma.done.wait [#allocation5], 128  }
 0x1fe   :  { %591 = vsyncadd [#allocation5], 4294967168 }
 0x1ff   :  { %365 = vsyncpa [#allocation4], 1 }
 0x200   :  { %366 = vsyncpa [#allocation7], 1 }
 0x201   :  { %367 = vsyncpa [#allocation10], 1 }
 0x202   :  { %368 = vsyncpa [#allocation5], 1 }

</bundles_post_ra>
